<compile_context>
chip_gen: v5e
topology: v5e:2x2
jax: 0.10.0
libtpu: 0.0.40
codegen_flags: <defaults>
</compile_context>

<pallas_src>
import functools

import jax
import jax.numpy as jnp
from jax.experimental import pallas as pl
from jax.experimental.pallas import tpu as pltpu


def _round_up(x, m):
    return ((x + m - 1) // m) * m


def _ffn_kernel_single(x_ref, w1_ref, b1_ref, w2_ref, b2_ref, o_ref,
                       *, matmul_dtype):
    """Whole d_ff resident: o = relu(x @ w1 + b1) @ w2 + b2 for one row tile."""
    x = x_ref[...]
    w1 = w1_ref[...]
    w2 = w2_ref[...]
    if matmul_dtype is not None:
        x = x.astype(matmul_dtype)
        w1 = w1.astype(matmul_dtype)
        w2 = w2.astype(matmul_dtype)

    h = jnp.dot(x, w1, preferred_element_type=jnp.float32)
    h = jnp.maximum(h + b1_ref[...].astype(jnp.float32), 0.0)
    # Dropout == identity (eval/inference semantics).
    y = jnp.dot(h.astype(w2.dtype), w2, preferred_element_type=jnp.float32)
    o_ref[...] = (y + b2_ref[...].astype(jnp.float32)).astype(o_ref.dtype)


def _ffn_kernel_chunked(x_ref, w1_ref, b1_ref, w2_ref, b2_ref, o_ref, acc_ref,
                        *, matmul_dtype):
    """One (row-tile, d_ff-chunk) step of y = relu(x@w1 + b1) @ w2 + b2.

    Grid axis 0: row tiles ("parallel").  Grid axis 1: d_ff chunks
    (reduction, "arbitrary").  acc_ref is an f32 VMEM accumulator resident
    across the reduction axis; the output is written on the last chunk only.
    """
    k = pl.program_id(1)

    @pl.when(k == 0)
    def _init():
        acc_ref[...] = jnp.zeros_like(acc_ref)

    x = x_ref[...]
    w1 = w1_ref[...]
    w2 = w2_ref[...]
    if matmul_dtype is not None:
        # bf16 MXU inputs (v6e/v7x native rate), f32 accumulation.
        x = x.astype(matmul_dtype)
        w1 = w1.astype(matmul_dtype)
        w2 = w2.astype(matmul_dtype)

    # h_chunk = relu(x @ w1[:, chunk] + b1[chunk])  (f32 epilogue math).
    h = jnp.dot(x, w1, preferred_element_type=jnp.float32)
    h = jnp.maximum(h + b1_ref[...].astype(jnp.float32), 0.0)
    # Dropout == identity (eval/inference semantics).

    acc_ref[...] += jnp.dot(h.astype(w2.dtype), w2,
                            preferred_element_type=jnp.float32)

    @pl.when(k == pl.num_programs(1) - 1)
    def _finalize():
        # b2 applied once in the epilogue, not per d_ff chunk.
        o_ref[...] = (acc_ref[...] + b2_ref[...].astype(jnp.float32)
                      ).astype(o_ref.dtype)


def positionwise_ffn(x, w1, b1, w2, b2, *, tm=256, tk=512, matmul_dtype=None):
    """y = relu(x @ w1 + b1) @ w2 + b2, dropout treated as identity.

    x:  [B, S, d_model]
    w1: [d_model, d_ff], b1: [d_ff]    (weights stored [in, out], so x @ W
    w2: [d_ff, d_model], b2: [d_model]  matches PyTorch's x @ weight.T)
    Returns [B, S, d_model].

    tm: row tile over the flattened [B*S, d_model] matrix (multiple of 8).
    tk: d_ff reduction chunk (multiple of 128 when < d_ff).
    matmul_dtype: optional MXU input dtype (e.g. jnp.bfloat16); accumulation
                  is always f32.
    """
    B, S, d_model = x.shape
    d_ff = w1.shape[1]
    M = B * S

    # ---- choose tiles & pad so the grid divides evenly -------------------
    tm = max(8, _round_up(tm, 8))
    tm = min(tm, _round_up(M, 8))          # don't tile past the real rows
    m_pad = _round_up(M, tm)

    tk = min(tk, d_ff)
    dff_pad = _round_up(d_ff, tk)

    x2d = x.reshape(M, d_model)
    if m_pad != M:
        x2d = jnp.pad(x2d, ((0, m_pad - M), (0, 0)))
    if dff_pad != d_ff:
        w1 = jnp.pad(w1, ((0, 0), (0, dff_pad - d_ff)))
        b1 = jnp.pad(b1, ((0, dff_pad - d_ff),))
        w2 = jnp.pad(w2, ((0, dff_pad - d_ff), (0, 0)))

    b1_2d = b1.reshape(1, dff_pad)
    b2_2d = b2.reshape(1, d_model)

    n_row = m_pad // tm
    n_k = dff_pad // tk

    # ---- VMEM budget / cost hints ----------------------------------------
    itemsize = x.dtype.itemsize
    vmem_needed = (
        2 * tm * d_model * itemsize                 # x block (double-buffered)
        + 2 * d_model * tk * w1.dtype.itemsize      # w1 chunk
        + 2 * tk * d_model * w2.dtype.itemsize      # w2 chunk
        + 2 * (tk + d_model) * itemsize             # biases
        + 2 * tm * d_model * itemsize               # output block
        + tm * d_model * 4                          # f32 accumulator scratch
        + tm * tk * 4                               # hidden chunk (live vregs)
    )
    # Leave headroom; stay under ~48 MiB for v7x's 64 MiB VMEM.
    vmem_limit = int(min(max(2 * vmem_needed, 32 * 1024 * 1024),
                         48 * 1024 * 1024))

    cost = pl.CostEstimate(
        flops=2 * 2 * M * d_model * d_ff,
        transcendentals=0,
        bytes_accessed=int((x2d.size + w1.size + b1.size + w2.size + b2.size
                            + m_pad * d_model) * itemsize),
    )

    out_shape = jax.ShapeDtypeStruct((m_pad, d_model), x.dtype)

    if n_k == 1:
        # Whole d_ff fits in one chunk: simpler kernel, no accumulator scratch.
        kernel = functools.partial(_ffn_kernel_single, matmul_dtype=matmul_dtype)
        out = pl.pallas_call(
            kernel,
            out_shape=out_shape,
            grid_spec=pltpu.PrefetchScalarGridSpec(
                num_scalar_prefetch=0,
                grid=(n_row,),
                in_specs=[
                    pl.BlockSpec((tm, d_model), lambda i: (i, 0)),
                    pl.BlockSpec((d_model, dff_pad), lambda i: (0, 0)),
                    pl.BlockSpec((1, dff_pad), lambda i: (0, 0)),
                    pl.BlockSpec((dff_pad, d_model), lambda i: (0, 0)),
                    pl.BlockSpec((1, d_model), lambda i: (0, 0)),
                ],
                out_specs=pl.BlockSpec((tm, d_model), lambda i: (i, 0)),
            ),
            compiler_params=pltpu.CompilerParams(
                dimension_semantics=("parallel",),
                vmem_limit_bytes=vmem_limit,
            ),
            cost_estimate=cost,
        )(x2d, w1, b1_2d, w2, b2_2d)
    else:
        kernel = functools.partial(_ffn_kernel_chunked, matmul_dtype=matmul_dtype)
        out = pl.pallas_call(
            kernel,
            out_shape=out_shape,
            grid_spec=pltpu.PrefetchScalarGridSpec(
                num_scalar_prefetch=0,
                grid=(n_row, n_k),
                in_specs=[
                    pl.BlockSpec((tm, d_model), lambda i, k: (i, 0)),
                    pl.BlockSpec((d_model, tk), lambda i, k: (0, k)),
                    pl.BlockSpec((1, tk), lambda i, k: (0, k)),
                    pl.BlockSpec((tk, d_model), lambda i, k: (k, 0)),
                    pl.BlockSpec((1, d_model), lambda i, k: (0, 0)),
                ],
                out_specs=pl.BlockSpec((tm, d_model), lambda i, k: (i, 0)),
                scratch_shapes=[pltpu.VMEM((tm, d_model), jnp.float32)],
            ),
            compiler_params=pltpu.CompilerParams(
                dimension_semantics=("parallel", "arbitrary"),
                vmem_limit_bytes=vmem_limit,
            ),
            cost_estimate=cost,
        )(x2d, w1, b1_2d, w2, b2_2d)

    if m_pad != M:
        out = out[:M]
    return out.reshape(B, S, d_model)


if __name__ == "__main__":
    # Small shapes consistent with the module: batch=2, seq=8,
    # d_model=32, d_ff=64.
    B, S, d_model, d_ff = 2, 8, 32, 64

    key = jax.random.PRNGKey(0)
    kx, kw1, kb1, kw2, kb2 = jax.random.split(key, 5)

    x = jax.random.normal(kx, (B, S, d_model), dtype=jnp.float32)
    # PyTorch nn.Linear stores weight as [out, in]; we keep [in, out] so the
    # kernel does x @ W, numerically identical to x @ weight.T.
    w1 = jax.random.normal(kw1, (d_model, d_ff), dtype=jnp.float32) * 0.02
    b1 = jax.random.normal(kb1, (d_ff,), dtype=jnp.float32) * 0.02
    w2 = jax.random.normal(kw2, (d_ff, d_model), dtype=jnp.float32) * 0.02
    b2 = jax.random.normal(kb2, (d_model,), dtype=jnp.float32) * 0.02

    ref = jnp.maximum(x @ w1 + b1, 0.0) @ w2 + b2

    # 1) Default tiling: single-chunk path (d_ff fits in one tile), one row
    #    tile after clamping tm to the real row count.
    out = positionwise_ffn(x, w1, b1, w2, b2)
    jax.block_until_ready(out)
    assert jnp.allclose(out, ref, atol=1e-5, rtol=1e-5), "single-chunk mismatch"

    # 2) Multi-step grid: exercises the parallel row axis (2 row tiles) and
    #    the d_ff reduction accumulator (d_ff=256 split into 2 chunks of 128).
    d_ff2 = 256
    w1b = jax.random.normal(kw1, (d_model, d_ff2), dtype=jnp.float32) * 0.02
    b1b = jax.random.normal(kb1, (d_ff2,), dtype=jnp.float32) * 0.02
    w2b = jax.random.normal(kw2, (d_ff2, d_model), dtype=jnp.float32) * 0.02
    ref2 = jnp.maximum(x @ w1b + b1b, 0.0) @ w2b + b2
    out2 = positionwise_ffn(x, w1b, b1b, w2b, b2, tm=8, tk=128)
    jax.block_until_ready(out2)
    assert jnp.allclose(out2, ref2, atol=1e-4, rtol=1e-4), "chunked mismatch"

    print("KERNEL_OK")
</pallas_src>

<mosaic_0001>
module attributes {stable_mosaic.version = 11 : i64} {
  func.func @_ffn_kernel_single(%arg0: i32, %arg1: memref<16x32xf32, #tpu.memory_space<vmem>>, %arg2: memref<32x64xf32, #tpu.memory_space<vmem>>, %arg3: memref<1x64xf32, #tpu.memory_space<vmem>>, %arg4: memref<64x32xf32, #tpu.memory_space<vmem>>, %arg5: memref<1x32xf32, #tpu.memory_space<vmem>>, %arg6: memref<16x32xf32, #tpu.memory_space<vmem>>) attributes {dimension_semantics = [#tpu.dimension_semantics<parallel>], iteration_bounds = array<i64: 1>, scalar_prefetch = 0 : i64, scratch_operands = 0 : i64, tpu.core_type = #tpu.core_type<tc>, window_params = [{transform_indices = @transform_0, window_bounds = array<i64: 16, 32>}, {pipeline_mode = #tpu.pipeline_mode<synchronous>, transform_indices = @transform_1, window_bounds = array<i64: 32, 64>}, {pipeline_mode = #tpu.pipeline_mode<synchronous>, transform_indices = @transform_2, window_bounds = array<i64: 1, 64>}, {pipeline_mode = #tpu.pipeline_mode<synchronous>, transform_indices = @transform_3, window_bounds = array<i64: 64, 32>}, {pipeline_mode = #tpu.pipeline_mode<synchronous>, transform_indices = @transform_4, window_bounds = array<i64: 1, 32>}, {transform_indices = @transform_5, window_bounds = array<i64: 16, 32>}]} {
    %c0 = arith.constant 0 : index
    %c0_0 = arith.constant 0 : index
    %0 = vector.load %arg1[%c0, %c0_0] : memref<16x32xf32, #tpu.memory_space<vmem>>, vector<16x32xf32>
    %c0_1 = arith.constant 0 : index
    %c0_2 = arith.constant 0 : index
    %1 = vector.load %arg2[%c0_1, %c0_2] : memref<32x64xf32, #tpu.memory_space<vmem>>, vector<32x64xf32>
    %c0_3 = arith.constant 0 : index
    %c0_4 = arith.constant 0 : index
    %2 = vector.load %arg4[%c0_3, %c0_4] : memref<64x32xf32, #tpu.memory_space<vmem>>, vector<64x32xf32>
    %cst = arith.constant dense<0.000000e+00> : vector<16x64xf32>
    %3 = tpu.matmul %0, %1, %cst {dimension_numbers = #tpu.dot_dimension_numbers<[1], [0], [0], [1], [0, 0, 1, 1], [], []>} : vector<16x32xf32>, vector<32x64xf32>, vector<16x64xf32> -> vector<16x64xf32>
    %c0_5 = arith.constant 0 : index
    %c0_6 = arith.constant 0 : index
    %4 = vector.load %arg3[%c0_5, %c0_6] : memref<1x64xf32, #tpu.memory_space<vmem>>, vector<1x64xf32>
    %5 = vector.broadcast %4 : vector<1x64xf32> to vector<16x64xf32>
    %6 = arith.addf %3, %5 : vector<16x64xf32>
    %cst_7 = arith.constant 0.000000e+00 : f32
    %7 = vector.broadcast %cst_7 : f32 to vector<16x64xf32>
    %8 = arith.maximumf %6, %7 : vector<16x64xf32>
    %cst_8 = arith.constant dense<0.000000e+00> : vector<16x32xf32>
    %9 = tpu.matmul %8, %2, %cst_8 {dimension_numbers = #tpu.dot_dimension_numbers<[1], [0], [0], [1], [0, 0, 1, 1], [], []>} : vector<16x64xf32>, vector<64x32xf32>, vector<16x32xf32> -> vector<16x32xf32>
    %c0_9 = arith.constant 0 : index
    %c0_10 = arith.constant 0 : index
    %10 = vector.load %arg5[%c0_9, %c0_10] : memref<1x32xf32, #tpu.memory_space<vmem>>, vector<1x32xf32>
    %11 = vector.broadcast %10 : vector<1x32xf32> to vector<16x32xf32>
    %12 = arith.addf %9, %11 : vector<16x32xf32>
    %c0_11 = arith.constant 0 : index
    %c0_12 = arith.constant 0 : index
    %13 = vector.load %arg6[%c0_11, %c0_12] : memref<16x32xf32, #tpu.memory_space<vmem>>, vector<16x32xf32>
    tpu.vector_store %arg6[%c0_11, %c0_12], %12 {strides = array<i32>} : memref<16x32xf32, #tpu.memory_space<vmem>>, vector<16x32xf32>,
    return
  }
  func.func @transform_0(%arg0: i32) -> (i32, i32) {
    %c0_i32 = arith.constant 0 : i32
    %c0_i32_0 = arith.constant 0 : i32
    return %arg0, %c0_i32 : i32, i32
  }
  func.func @transform_1(%arg0: i32) -> (i32, i32) {
    %c0_i32 = arith.constant 0 : i32
    %c0_i32_0 = arith.constant 0 : i32
    %c0_i32_1 = arith.constant 0 : i32
    return %c0_i32, %c0_i32_0 : i32, i32
  }
  func.func @transform_2(%arg0: i32) -> (i32, i32) {
    %c0_i32 = arith.constant 0 : i32
    %c0_i32_0 = arith.constant 0 : i32
    %c0_i32_1 = arith.constant 0 : i32
    return %c0_i32, %c0_i32_0 : i32, i32
  }
  func.func @transform_3(%arg0: i32) -> (i32, i32) {
    %c0_i32 = arith.constant 0 : i32
    %c0_i32_0 = arith.constant 0 : i32
    %c0_i32_1 = arith.constant 0 : i32
    return %c0_i32, %c0_i32_0 : i32, i32
  }
  func.func @transform_4(%arg0: i32) -> (i32, i32) {
    %c0_i32 = arith.constant 0 : i32
    %c0_i32_0 = arith.constant 0 : i32
    %c0_i32_1 = arith.constant 0 : i32
    return %c0_i32, %c0_i32_0 : i32, i32
  }
  func.func @transform_5(%arg0: i32) -> (i32, i32) {
    %c0_i32 = arith.constant 0 : i32
    %c0_i32_0 = arith.constant 0 : i32
    return %arg0, %c0_i32 : i32, i32
  }
}

</mosaic_0001>

<bundles_post_ra>
// kernel: tpu_custom_call.1
= control target key start
LH: loop header
LB: loop body
LE: loop exit
PB: predicated region body
PF: predicated region fallthrough
CT: control target
= control target key end

     0   :  { %s260_s0 = inlined_call_operand.vmem [shape: f32[16,32], index: 0, kind: input, shape index: {}]   ;;  %s261_s1 = inlined_call_operand.vmem [shape: f32[32,64], index: 1, kind: input, shape index: {}]   ;;  %s262_s2 = inlined_call_operand.vmem [shape: f32[1,64], index: 2, kind: input, shape index: {}]   ;;  %s263_s3 = inlined_call_operand.vmem [shape: f32[64,32], index: 3, kind: input, shape index: {}]   ;;  %s264_s4 = inlined_call_operand.vmem [shape: f32[1,32], index: 4, kind: input, shape index: {}]   ;;  %s265_s5 = inlined_call_operand.hbm [shape: f32[16,32], index: 5, kind: output, shape index: {}]  }
   0x1   :  { %v26_v0 = vld [vmem:[%s261_s1 + $0x18] sm:$0xff]  ;;  %v25_v1 = vld [vmem:[%s261_s1 + $0x10] sm:$0xff]  ;;  %v24_v2 = vld [vmem:[%s261_s1 + $0x8] sm:$0xff] }
   0x2   :  { %129 = vmatpush.msra.mxu3 %v26_v0  ;;  %58 = vmatpush.msra.mxu0 %v26_v0  ;;  %v34_v3 = vld [vmem:[%s263_s3 + $0x38] sm:$0xff]  ;;  %v33_v4 = vld [vmem:[%s263_s3 + $0x30] sm:$0xff]  ;;  %v23_v5 = vld [vmem:[%s261_s1] sm:$0xff] }
   0x3   :  { %133 = vmatpush.msra.mxu2 %v34_v3  ;;  %90 = vmatpush.msra.mxu1 %v34_v3 }
   0x4   :  { %130 = vmatpush.msra.mxu3 %v25_v1  ;;  %59 = vmatpush.msra.mxu0 %v25_v1 }
   0x5   :  { %10 = vsyncpa [#allocation3], 0  ;;  %v22_v6 = vld [vmem:[%s260_s0 + $0x8] sm:$0xff]  ;;  %vm39_vm0 = vcmask 261120   ;;  %v21_v7 = vld [vmem:[%s260_s0] sm:$0xff]  ;;  %134 = vmatpush.msra.mxu2 %v33_v4  ;;  %91 = vmatpush.msra.mxu1 %v33_v4  ;;  %vm75_vm1 = vcmask 523264  }
   0x6   :  { %131 = vmatpush.msra.mxu3 %v24_v2  ;;  %60 = vmatpush.msra.mxu0 %v24_v2  ;;  %v32_v8 = vld [vmem:[%s263_s3 + $0x28] sm:$0xff]  ;;  %v31_v9 = vld [vmem:[%s263_s3 + $0x20] sm:$0xff]  ;;  %v30_v10 = vld [vmem:[%s263_s3 + $0x18] sm:$0xff]  ;;  %s113_s25 = sshll.u32 %s265_s5, 4  ;;  %s173_s26 = smov 128   ;;  %s114_s25 = int_to_ptr.hbm [resolvable:$true] %s113_s25 }
   0x7   :  { %135 = vmatpush.msra.mxu2 %v32_v8  ;;  %92 = vmatpush.msra.mxu1 %v32_v8  ;;  %v29_v11 = vld [vmem:[%s263_s3 + $0x10] sm:$0xff]  ;;  %v28_v12 = vld [vmem:[%s263_s3 + $0x8] sm:$0xff]  ;;  %v27_v13 = vld [vmem:[%s263_s3] sm:$0xff]  ;;  %s172_s3 = smov [#allocation2]   ;;  %s174_s27 = smov 8  }
   0x8   :  { %132 = vmatpush.msra.mxu3 %v23_v5  ;;  %61 = vmatpush.msra.mxu0 %v23_v5  ;;  %v144_v14 = vld [vmem:[%s262_s2] ss:$0 sm:$0xff]  ;;  %s111_s23 = sshll.u32 %s172_s3, 4  ;;  %s112_s23 = int_to_ptr.vmem [resolvable:$true] %s111_s23 }
   0x9   :  { %126 = vmatmul.msk.f32.vlgmr.msra.gmra.mxu3 %vm39_vm0, %v22_v6  ;;  %125 = vmatmul.msk.f32.vlgmr.msra.gmra.mxu0 %vm39_vm0, %v21_v7  ;;  %v145_v21 = vld [vmem:[%s264_s4] ss:$0 sm:$0xff] }
   0xa   :  { %136 = vmatpush.msra.mxu2 %v31_v9  ;;  %93 = vmatpush.msra.mxu1 %v31_v9 }
   0xc   :  { %137 = vmatpush.msra.mxu2 %v30_v10  ;;  %94 = vmatpush.msra.mxu1 %v30_v10 }
   0xe   :  { %138 = vmatpush.msra.mxu2 %v29_v11  ;;  %95 = vmatpush.msra.mxu1 %v29_v11 }
  0x10   :  { %139 = vmatpush.msra.mxu2 %v28_v12  ;;  %96 = vmatpush.msra.mxu1 %v28_v12 }
  0x12   :  { %140 = vmatpush.msra.mxu2 %v27_v13  ;;  %97 = vmatpush.msra.mxu1 %v27_v13 }
  0x86   :  { %v63_v15 = vpop.f32.mrf.mxu0 }
  0x87   :  { %v64_v16 = vadd.f32 %v144_v14, %v63_v15 }
  0x89   :  { %v69_v17 = vmax.f32 %v64_v16, 0.0 }
  0x8b   :  { %127 = vmatmul.msk.f32.vlgmr.msra.gmra.mxu1 %vm75_vm1, %v69_v17 }
  0x8c   :  { %v66_v18 = vpop.f32.mrf.mxu3 }
  0x8d   :  { %v67_v19 = vadd.f32 %v144_v14, %v66_v18 }
  0x8f   :  { %v70_v20 = vmax.f32 %v67_v19, 0.0 }
  0x91   :  { %128 = vmatmul.msk.f32.vlgmr.msra.gmra.mxu2 %vm75_vm1, %v70_v20 }
 0x108   :  { %v99_v22 = vpop.f32.mrf.mxu1 }
 0x109   :  { %v100_v23 = vadd.f32 %v145_v21, %v99_v22 }
 0x10b   :  { %105 = vst.msk [vmem:[#allocation2] sm:$0xff] %vm39_vm0, %v100_v23 }
 0x114   :  { %v102_v24 = vpop.f32.mrf.mxu2 }
 0x115   :  { %v103_v25 = vadd.f32 %v145_v21, %v102_v24 }
 0x117   :  { %106 = vst.msk [vmem:[#allocation2 + $0x8] sm:$0xff] %vm39_vm0, %v103_v25 }
 0x118   :  { %119 = dma.vmem_to_hbm [thread:$0]  %s112_s23, 256, %s114_s25, [#allocation3], %s173_s26, %s173_s26, %s174_s27  }
 0x119   :  { %170 = dma.done.wait [#allocation3], 256  }
 0x11a   :  { %171 = vsyncadd [#allocation3], 4294967040 }
 0x11b   :  { %124 = vsyncpa [#allocation3], 1 }

</bundles_post_ra>
